<compile_context>
chip_gen: v7x
topology: tpu7x:2x2x1
jax: 0.10.0
libtpu: 0.0.40
codegen_flags: <defaults>
</compile_context>

<pallas_src>
import functools

import jax
import jax.numpy as jnp
from jax.experimental import pallas as pl
from jax.experimental.pallas import tpu as pltpu


def _sensornet_kernel(x_ref, w1_ref, b1_ref, w2_ref, b2_ref, w3_ref, b3_ref,
                      o_ref):
    """Fused W3@relu(W2@relu(W1@x+b1)+b2)+b3 -> relu, on one (C, tile_l) block."""
    x = x_ref[0]                                                 # (c_in, tile_l)
    h = jnp.dot(w1_ref[...], x, preferred_element_type=jnp.float32) + b1_ref[...]
    h = jnp.maximum(h, 0.0)                                      # (c_mid, tile_l)
    h = jnp.dot(w2_ref[...], h, preferred_element_type=jnp.float32) + b2_ref[...]
    h = jnp.maximum(h, 0.0)                                      # (40, tile_l)
    h = jnp.dot(w3_ref[...], h, preferred_element_type=jnp.float32) + b3_ref[...]
    h = jnp.maximum(h, 0.0)                                      # (20, tile_l)
    o_ref[...] = h[None].astype(o_ref.dtype)                     # (1, 20, tile_l)


def _round_up(x, m):
    return pl.cdiv(x, m) * m


@functools.partial(jax.jit, static_argnames=("tile_l",))
def sensornet_forward(x, params, *, tile_l=1024):
    """x: (N, C_in, L) float32 -> (N, 20 * L) float32 (== torch.flatten(conv_out, 1))."""
    w1, b1, w2, b2, w3, b3 = params
    n, c_in, length = x.shape
    c_mid = w1.shape[0]      # out_chan of conv1
    c_h2 = w2.shape[0]       # 40
    c_out = w3.shape[0]      # 20

    # Lane tile along L: multiple of 128, no larger than the (padded) problem.
    lane_tile = min(tile_l, _round_up(length, 128))
    l_pad = _round_up(length, lane_tile)
    if l_pad != length:
        # Zero-padded tail columns compute relu(bias) garbage; sliced off below.
        x = jnp.pad(x, ((0, 0), (0, 0), (0, l_pad - length)))

    grid = (n, l_pad // lane_tile)

    out = pl.pallas_call(
        _sensornet_kernel,
        out_shape=jax.ShapeDtypeStruct((n, c_out, l_pad), jnp.float32),
        grid_spec=pltpu.PrefetchScalarGridSpec(
            num_scalar_prefetch=0,
            grid=grid,
            in_specs=[
                pl.BlockSpec((1, c_in, lane_tile), lambda b, l: (b, 0, l)),
                pl.BlockSpec((c_mid, c_in), lambda b, l: (0, 0)),
                pl.BlockSpec((c_mid, 1), lambda b, l: (0, 0)),
                pl.BlockSpec((c_h2, c_mid), lambda b, l: (0, 0)),
                pl.BlockSpec((c_h2, 1), lambda b, l: (0, 0)),
                pl.BlockSpec((c_out, c_h2), lambda b, l: (0, 0)),
                pl.BlockSpec((c_out, 1), lambda b, l: (0, 0)),
            ],
            out_specs=pl.BlockSpec((1, c_out, lane_tile), lambda b, l: (b, 0, l)),
        ),
        compiler_params=pltpu.CompilerParams(
            dimension_semantics=("parallel", "parallel")),
    )(x, w1, b1, w2, b2, w3, b3)

    out = out[:, :, :length]                 # drop L padding; still NCL like torch
    return out.reshape(n, c_out * length)    # torch.flatten(x, 1)


def xavier_uniform(key, fan_in, fan_out):
    """Matches nn.init.xavier_uniform_ for Conv1d weight (out, in, 1) -> (out, in)."""
    bound = (6.0 / (fan_in + fan_out)) ** 0.5
    return jax.random.uniform(key, (fan_out, fan_in), jnp.float32, -bound, bound)


def make_params(key, in_chan, out_chan):
    k1, k2, k3 = jax.random.split(key, 3)
    w1 = xavier_uniform(k1, in_chan, out_chan)        # (out_chan, in_chan)
    b1 = jnp.zeros((out_chan, 1), jnp.float32)
    w2 = xavier_uniform(k2, out_chan, 40)             # (40, out_chan)
    b2 = jnp.zeros((40, 1), jnp.float32)
    w3 = xavier_uniform(k3, 40, 20)                   # (20, 40)
    b3 = jnp.zeros((20, 1), jnp.float32)
    return (w1, b1, w2, b2, w3, b3)


def reference_forward(x, params):
    """Pure-JAX reference of the PyTorch forward (for correctness check)."""
    w1, b1, w2, b2, w3, b3 = params
    hp = jax.lax.Precision.HIGHEST
    h = jnp.einsum("ncl,oc->nol", x, w1, precision=hp) + b1.reshape(1, -1, 1)
    h = jnp.maximum(h, 0.0)
    h = jnp.einsum("ncl,oc->nol", h, w2, precision=hp) + b2.reshape(1, -1, 1)
    h = jnp.maximum(h, 0.0)
    h = jnp.einsum("ncl,oc->nol", h, w3, precision=hp) + b3.reshape(1, -1, 1)
    h = jnp.maximum(h, 0.0)
    return h.reshape(h.shape[0], -1)


if __name__ == "__main__":
    key = jax.random.PRNGKey(0)
    k_x, k_p = jax.random.split(key)

    # Small shapes consistent with the module: Conv1d input (N, C_in, L)
    N, IN_CHAN, OUT_CHAN, L = 2, 4, 32, 16
    x = jax.random.normal(k_x, (N, IN_CHAN, L), jnp.float32)
    params = make_params(k_p, IN_CHAN, OUT_CHAN)

    out = sensornet_forward(x, params)
    out = jax.block_until_ready(out)

    ref = reference_forward(x, params)
    assert out.shape == (N, 20 * L), out.shape
    assert jnp.allclose(out, ref, atol=1e-5, rtol=1e-5), "mismatch vs reference"

    print("KERNEL_OK")
</pallas_src>

<mosaic_0001>
module attributes {stable_mosaic.version = 11 : i64} {
  func.func @_sensornet_kernel(%arg0: i32, %arg1: i32, %arg2: memref<1x4x128xf32, #tpu.memory_space<vmem>>, %arg3: memref<32x4xf32, #tpu.memory_space<vmem>>, %arg4: memref<32x1xf32, #tpu.memory_space<vmem>>, %arg5: memref<40x32xf32, #tpu.memory_space<vmem>>, %arg6: memref<40x1xf32, #tpu.memory_space<vmem>>, %arg7: memref<20x40xf32, #tpu.memory_space<vmem>>, %arg8: memref<20x1xf32, #tpu.memory_space<vmem>>, %arg9: memref<1x20x128xf32, #tpu.memory_space<vmem>>) attributes {dimension_semantics = [#tpu.dimension_semantics<parallel>, #tpu.dimension_semantics<parallel>], iteration_bounds = array<i64: 2, 1>, scalar_prefetch = 0 : i64, scratch_operands = 0 : i64, tpu.core_type = #tpu.core_type<tc>, window_params = [{transform_indices = @transform_0, window_bounds = array<i64: 1, 4, 128>}, {pipeline_mode = #tpu.pipeline_mode<synchronous>, transform_indices = @transform_1, window_bounds = array<i64: 32, 4>}, {pipeline_mode = #tpu.pipeline_mode<synchronous>, transform_indices = @transform_2, window_bounds = array<i64: 32, 1>}, {pipeline_mode = #tpu.pipeline_mode<synchronous>, transform_indices = @transform_3, window_bounds = array<i64: 40, 32>}, {pipeline_mode = #tpu.pipeline_mode<synchronous>, transform_indices = @transform_4, window_bounds = array<i64: 40, 1>}, {pipeline_mode = #tpu.pipeline_mode<synchronous>, transform_indices = @transform_5, window_bounds = array<i64: 20, 40>}, {pipeline_mode = #tpu.pipeline_mode<synchronous>, transform_indices = @transform_6, window_bounds = array<i64: 20, 1>}, {transform_indices = @transform_7, window_bounds = array<i64: 1, 20, 128>}]} {
    %c0 = arith.constant 0 : index
    %c0_0 = arith.constant 0 : index
    %c0_1 = arith.constant 0 : index
    %0 = vector.load %arg2[%c0, %c0_0, %c0_1] : memref<1x4x128xf32, #tpu.memory_space<vmem>>, vector<1x4x128xf32>
    %1 = vector.shape_cast %0 : vector<1x4x128xf32> to vector<4x128xf32>
    %c0_2 = arith.constant 0 : index
    %c0_3 = arith.constant 0 : index
    %2 = vector.load %arg3[%c0_2, %c0_3] : memref<32x4xf32, #tpu.memory_space<vmem>>, vector<32x4xf32>
    %cst = arith.constant dense<0.000000e+00> : vector<32x128xf32>
    %3 = tpu.matmul %2, %1, %cst {dimension_numbers = #tpu.dot_dimension_numbers<[1], [0], [0], [1], [0, 0, 1, 1], [], []>} : vector<32x4xf32>, vector<4x128xf32>, vector<32x128xf32> -> vector<32x128xf32>
    %c0_4 = arith.constant 0 : index
    %c0_5 = arith.constant 0 : index
    %4 = vector.load %arg4[%c0_4, %c0_5] : memref<32x1xf32, #tpu.memory_space<vmem>>, vector<32x1xf32>
    %5 = vector.broadcast %4 : vector<32x1xf32> to vector<32x128xf32>
    %6 = arith.addf %3, %5 : vector<32x128xf32>
    %cst_6 = arith.constant 0.000000e+00 : f32
    %7 = vector.broadcast %cst_6 : f32 to vector<32x128xf32>
    %8 = arith.maximumf %6, %7 : vector<32x128xf32>
    %c0_7 = arith.constant 0 : index
    %c0_8 = arith.constant 0 : index
    %9 = vector.load %arg5[%c0_7, %c0_8] : memref<40x32xf32, #tpu.memory_space<vmem>>, vector<40x32xf32>
    %cst_9 = arith.constant dense<0.000000e+00> : vector<40x128xf32>
    %10 = tpu.matmul %9, %8, %cst_9 {dimension_numbers = #tpu.dot_dimension_numbers<[1], [0], [0], [1], [0, 0, 1, 1], [], []>} : vector<40x32xf32>, vector<32x128xf32>, vector<40x128xf32> -> vector<40x128xf32>
    %c0_10 = arith.constant 0 : index
    %c0_11 = arith.constant 0 : index
    %11 = vector.load %arg6[%c0_10, %c0_11] : memref<40x1xf32, #tpu.memory_space<vmem>>, vector<40x1xf32>
    %12 = vector.broadcast %11 : vector<40x1xf32> to vector<40x128xf32>
    %13 = arith.addf %10, %12 : vector<40x128xf32>
    %cst_12 = arith.constant 0.000000e+00 : f32
    %14 = vector.broadcast %cst_12 : f32 to vector<40x128xf32>
    %15 = arith.maximumf %13, %14 : vector<40x128xf32>
    %c0_13 = arith.constant 0 : index
    %c0_14 = arith.constant 0 : index
    %16 = vector.load %arg7[%c0_13, %c0_14] : memref<20x40xf32, #tpu.memory_space<vmem>>, vector<20x40xf32>
    %cst_15 = arith.constant dense<0.000000e+00> : vector<20x128xf32>
    %17 = tpu.matmul %16, %15, %cst_15 {dimension_numbers = #tpu.dot_dimension_numbers<[1], [0], [0], [1], [0, 0, 1, 1], [], []>} : vector<20x40xf32>, vector<40x128xf32>, vector<20x128xf32> -> vector<20x128xf32>
    %c0_16 = arith.constant 0 : index
    %c0_17 = arith.constant 0 : index
    %18 = vector.load %arg8[%c0_16, %c0_17] : memref<20x1xf32, #tpu.memory_space<vmem>>, vector<20x1xf32>
    %19 = vector.broadcast %18 : vector<20x1xf32> to vector<20x128xf32>
    %20 = arith.addf %17, %19 : vector<20x128xf32>
    %cst_18 = arith.constant 0.000000e+00 : f32
    %21 = vector.broadcast %cst_18 : f32 to vector<20x128xf32>
    %22 = arith.maximumf %20, %21 : vector<20x128xf32>
    %23 = vector.shape_cast %22 : vector<20x128xf32> to vector<1x20x128xf32>
    %c0_19 = arith.constant 0 : index
    %c0_20 = arith.constant 0 : index
    %c0_21 = arith.constant 0 : index
    %24 = vector.load %arg9[%c0_19, %c0_20, %c0_21] : memref<1x20x128xf32, #tpu.memory_space<vmem>>, vector<1x20x128xf32>
    tpu.vector_store %arg9[%c0_19, %c0_20, %c0_21], %23 {strides = array<i32>} : memref<1x20x128xf32, #tpu.memory_space<vmem>>, vector<1x20x128xf32>,
    return
  }
  func.func @transform_0(%arg0: i32, %arg1: i32) -> (i32, i32, i32) {
    %c0_i32 = arith.constant 0 : i32
    %c0_i32_0 = arith.constant 0 : i32
    return %arg0, %c0_i32, %arg1 : i32, i32, i32
  }
  func.func @transform_1(%arg0: i32, %arg1: i32) -> (i32, i32) {
    %c0_i32 = arith.constant 0 : i32
    %c0_i32_0 = arith.constant 0 : i32
    %c0_i32_1 = arith.constant 0 : i32
    return %c0_i32, %c0_i32_0 : i32, i32
  }
  func.func @transform_2(%arg0: i32, %arg1: i32) -> (i32, i32) {
    %c0_i32 = arith.constant 0 : i32
    %c0_i32_0 = arith.constant 0 : i32
    %c0_i32_1 = arith.constant 0 : i32
    return %c0_i32, %c0_i32_0 : i32, i32
  }
  func.func @transform_3(%arg0: i32, %arg1: i32) -> (i32, i32) {
    %c0_i32 = arith.constant 0 : i32
    %c0_i32_0 = arith.constant 0 : i32
    %c0_i32_1 = arith.constant 0 : i32
    return %c0_i32, %c0_i32_0 : i32, i32
  }
  func.func @transform_4(%arg0: i32, %arg1: i32) -> (i32, i32) {
    %c0_i32 = arith.constant 0 : i32
    %c0_i32_0 = arith.constant 0 : i32
    %c0_i32_1 = arith.constant 0 : i32
    return %c0_i32, %c0_i32_0 : i32, i32
  }
  func.func @transform_5(%arg0: i32, %arg1: i32) -> (i32, i32) {
    %c0_i32 = arith.constant 0 : i32
    %c0_i32_0 = arith.constant 0 : i32
    %c0_i32_1 = arith.constant 0 : i32
    return %c0_i32, %c0_i32_0 : i32, i32
  }
  func.func @transform_6(%arg0: i32, %arg1: i32) -> (i32, i32) {
    %c0_i32 = arith.constant 0 : i32
    %c0_i32_0 = arith.constant 0 : i32
    %c0_i32_1 = arith.constant 0 : i32
    return %c0_i32, %c0_i32_0 : i32, i32
  }
  func.func @transform_7(%arg0: i32, %arg1: i32) -> (i32, i32, i32) {
    %c0_i32 = arith.constant 0 : i32
    %c0_i32_0 = arith.constant 0 : i32
    return %arg0, %c0_i32, %arg1 : i32, i32, i32
  }
}

</mosaic_0001>

<bundles_post_ra>
// kernel: sensornet_forward.1
= control target key start
LH: loop header
LB: loop body
LE: loop exit
PB: predicated region body
PF: predicated region fallthrough
CT: control target
= control target key end

     0   :  { %s990_s24 = smov 0   ;;  %s992_s25 = smov 0   ;;  %s1120_s0 = inlined_call_operand.vmem [shape: f32[2,4,128], index: 0, kind: input, shape index: {}]   ;;  %s1121_s1 = inlined_call_operand.vmem [shape: f32[32,4], index: 1, kind: input, shape index: {}]   ;;  %s1122_s2 = inlined_call_operand.vmem [shape: f32[32,1], index: 2, kind: input, shape index: {}]   ;;  %s1123_s3 = inlined_call_operand.vmem [shape: f32[40,32], index: 3, kind: input, shape index: {}]   ;;  %s1124_s4 = inlined_call_operand.vmem [shape: f32[40,1], index: 4, kind: input, shape index: {}]   ;;  %s1125_s5 = inlined_call_operand.vmem [shape: f32[20,40], index: 5, kind: input, shape index: {}]   ;;  %s1126_s6 = inlined_call_operand.vmem [shape: f32[20,1], index: 6, kind: input, shape index: {}]   ;;  %s1127_s7 = inlined_call_operand.vmem [shape: f32[2,20,128], index: 7, kind: output, shape index: {}]  }
   0x1   :  { %s994_s26 = smov 0  }
   0x2 LB: > { %s29_s27 = sadd.s32 1, %s940_s25  ;;  %p789_p0 = scmp.ge.s32.totalorder %s944_s26, 1  ;;  %s944_s26 = sphi %s994_s26, %s17_s26   ;;  %s940_s25 = sphi %s992_s25, %s1129_s25   ;;  %s936_s24 = sphi %s990_s24, %s1128_s24  }
   0x3   : > { %p31_p1 = scmp.ge.s32.totalorder %s29_s27, 2  ;;  %p255_p2 = scmp.lt.s32.totalorder %s944_s26, 3 }
   0x5   : > { %s1131_s27 = smov (%p31_p1, %s29_s27), 0  ;;  %p256_p3 = pnand %p789_p0, %p255_p2 }
   0x6   : > { %p292_p4 = scmp.lt.s32.totalorder (!%p256_p3), %s936_s24, 1  ;;  %v308_v0 = vld [vmem:[%s1121_s1] sm:$0xff] (!%p256_p3)  ;;  %vm336_vm0 = vcmask (!%p256_p3), 31744   ;;  %v314_v2 = vld [vmem:[%s1122_s2 + $0x10] sm:$0xff] (!%p256_p3)  ;;  %v946_v3 = vmov (!%p256_p3), 0   ;;  %vm349_vm1 = vcmask (!%p256_p3), 1043456  }
   0x7   : > { %259 = sbr.rel (%p256_p3) target bundleno = 706 (0x2c2), region = 48  ;;  %831 = vmatprep.mubr.msk.f32.mxu0 (!%p256_p3), %vm336_vm0, %v308_v0  ;;  %v312_v1 = vld [vmem:[%s1122_s2] sm:$0xff] (!%p256_p3)  ;;  %920 = vset.pattern.permute.xlu0 (!%p256_p3), %v946_v3  ;;  %v313_v4 = vld [vmem:[%s1122_s2 + $0x8] sm:$0xff] (!%p256_p3)  ;;  %v315_v5 = vld [vmem:[%s1122_s2 + $0x18] sm:$0xff] (!%p256_p3)  ;;  %v947_v18 = vmov (!%p256_p3), 0.0|0.0   ;;  %vm948_vm2 = vmmov (!%p256_p3), 0  }
   0x8   : > { %921 = vset.pattern.permute.xlu1 (!%p256_p3), %v946_v3  ;;  %318 = vperm.xlu0 (!%p256_p3), %920, %v312_v1   ;;  %v309_v7 = vld [vmem:[%s1121_s1 + $0x8] sm:$0xff] (!%p256_p3)  ;;  %v310_v8 = vld [vmem:[%s1121_s1 + $0x10] sm:$0xff] (!%p256_p3)  ;;  %v447_v9 = vld [vmem:[%s1124_s4] sm:$0xff] (!%p256_p3)  ;;  %v949_v19 = vmov (!%p256_p3), 0.0   ;;  %vm477_vm3 = vcmask (!%p256_p3), 261120   ;;  %vm609_vm4 = vcmask (!%p256_p3), 326656  }
   0x9   : > { %328 = vperm.xlu1 (!%p256_p3), %921, %v314_v2   ;;  %v448_v10 = vld [vmem:[%s1124_s4 + $0x8] sm:$0xff] (!%p256_p3)  ;;  %v311_v11 = vld [vmem:[%s1121_s1 + $0x18] sm:$0xff] (!%p256_p3)  ;;  %v449_v12 = vld [vmem:[%s1124_s4 + $0x10] sm:$0xff] (!%p256_p3)  ;;  %879 = vmatprep.subr.bf16.mxu1 (!%p256_p3), %v947_v18 }
   0xa   : > { %v450_v13 = vld [vmem:[%s1124_s4 + $0x18] sm:$0xff] (!%p256_p3)  ;;  %v451_v14 = vld [vmem:[%s1124_s4 + $0x20] sm:$0xff] (!%p256_p3)  ;;  %v592_v16 = vld [vmem:[%s1126_s6 + $0x8] sm:$0xff] (!%p256_p3)  ;;  %845 = vmatprep.mubr.msk.f32.mxu1 (!%p256_p3), %vm948_vm2, %v949_v19 }
   0xb   : > { %v591_v15 = vld [vmem:[%s1126_s6] sm:$0xff] (!%p256_p3)  ;;  %v593_v17 = vld [vmem:[%s1126_s6 + $0x10] sm:$0xf] (!%p256_p3)  ;;  %v443_v39 = vld [vmem:[%s1123_s3 + $0x8] sm:$0xff] (!%p256_p3) }
   0xc   : > { %323 = vperm.xlu0 (!%p256_p3), %920, %v313_v4   ;;  %v442_v38 = vld [vmem:[%s1123_s3] sm:$0xff] (!%p256_p3)  ;;  %v444_v40 = vld [vmem:[%s1123_s3 + $0x10] sm:$0xff] (!%p256_p3)  ;;  %v445_v41 = vld [vmem:[%s1123_s3 + $0x18] sm:$0xff] (!%p256_p3) }
   0xd   : > { %333 = vperm.xlu1 (!%p256_p3), %921, %v315_v5   ;;  %v446_v42 = vld [vmem:[%s1123_s3 + $0x20] sm:$0xff] (!%p256_p3) }
   0xe   : > { %s1133_s24 = smov (!%p292_p4, %s936_s24), 1 }
   0xf   : > { %s790_s11 = sshll.u32 %s1133_s24, 2  ;;  %s891_s19 = smul.u32 24, %s1133_s24 }
  0x10   : > { %s298_s16 = scalar_lea.vmem %s1120_s0, %s790_s11  ;;  %454 = vperm.xlu0 %920, %v447_v9  }
  0x11   : > { %v307_v6 = vld [vmem:[%s298_s16] sm:$0xf]  ;;  %459 = vperm.xlu1 %921, %v448_v10   ;;  %s306_s22 = scalar_lea.vmem %s1127_s7, %s891_s19 }
  0x12   : > { %829 = vmatprep.subr.msk.mxu0 %vm349_vm1, %v307_v6 }
  0x13   : > { %830 = vmatpush3.msk.msra.mxu0 %vm349_vm1, %v307_v6  ;;  %v588_v6 = vld [vmem:[%s1125_s5] sm:$0xff] }
  0x14   : > { %832 = vmatmul.mubr.msk.f32.vlgmr.msra.gmra.mrb[0].mxu0 %vm336_vm0, %v309_v7  ;;  %464 = vperm.xlu0 %920, %v449_v12   ;;  %v589_v7 = vld [vmem:[%s1125_s5 + $0x8] sm:$0xff] }
  0x15   : > { %834 = vmatprep.mubr.msk.f32.mxu0 %vm336_vm0, %v310_v8  ;;  %469 = vperm.xlu1 %921, %v450_v13   ;;  %v590_v8 = vld [vmem:[%s1125_s5 + $0x10] sm:$0xf] }
  0x16   : > { %885 = vmatprep.subr.bf16.mxu0 %v947_v18 }
  0x18   : > { %835 = vmatmul.mubr.msk.f32.gmra.mrb[2].mxu0 %vm336_vm0, %v311_v11  ;;  %474 = vperm.xlu0 %920, %v451_v14  }
  0x19   : > { %596 = vperm.xlu1 %921, %v591_v15   ;;  %870 = vmatprep.mubr.msk.f32.mxu0 %vm948_vm2, %v949_v19 }
  0x1c   : > { %601 = vperm.xlu0 %920, %v592_v16  }
  0x1d   : > { %606 = vperm.xlu1 %921, %v593_v17  }
  0x87   : > { %v319_v20 = vpop.permute.xlu0 %318 }
  0x88   : > { %v329_v21 = vpop.permute.xlu1 %328 }
  0x8b   : > { %v324_v22 = vpop.permute.xlu0 %323 }
  0x8c   : > { %v334_v28 = vpop.permute.xlu1 %333 }
  0x8f   : > { %v455_v45 = vpop.permute.xlu0 %454 }
  0x90   : > { %v460_v47 = vpop.permute.xlu1 %459 }
  0x93   : > { %v465_v56 = vpop.permute.xlu0 %464 }
  0x94   : > { %v470_v58 = vpop.permute.xlu1 %469 }
  0x97   : > { %v475_v0 = vpop.permute.xlu0 %474 }
  0x98   : > { %v597_v9 = vpop.permute.xlu1 %596 }
  0x9b   : > { %v602_v14 = vpop.permute.xlu0 %601 }
  0xe7   : > { %v833_v23 = vpop.f32.mrb[0].mxu0 }
  0xe8   : > { %v425_v24 = vadd.f32 %v833_v23, %v324_v22  ;;  %v419_v25 = vpop.f32.mrb[1].mxu0 }
  0xe9   : > { %v420_v26 = vadd.f32 %v419_v25, %v319_v20 }
  0xea   : > { %v439_v27 = vmax.f32 %v425_v24, 0.0 }
  0xeb   : > { %v438_v29 = vmax.f32 %v420_v26, 0.0  ;;  %v836_v30 = vpop.f32.mrb[2].mxu0 }
  0xec   : > { %v435_v31 = vadd.f32 %v836_v30, %v334_v28  ;;  %v429_v32 = vpop.f32.mrb[3].mxu0 }
  0xed   : > { %v430_v33 = vadd.f32 %v429_v32, %v329_v21  ;;  %v880_v34 = vpack.c.bf16 %v439_v27, %v438_v29 }
  0xee   : > { %v441_v35 = vmax.f32 %v435_v31, 0.0 }
  0xef   : > { %v440_v36 = vmax.f32 %v430_v33, 0.0  ;;  %881 = vmatpush3.bf16.msra.mxu1 %v880_v34 }
  0xf0   : > { %882 = vmatprep.subr.bf16.mxu1 %v947_v18 }
  0xf1   : > { %v883_v37 = vpack.c.bf16 %v441_v35, %v440_v36 }
  0xf3   : > { %884 = vmatpush3.bf16.msra.mxu1 %v883_v37 }
  0xf6   : > { %846 = vmatmul.mubr.msk.f32.vlgmr.msra.gmra.mrb[0].mxu1 %vm477_vm3, %v442_v38 }
  0xf7   : > { %848 = vmatprep.mubr.msk.f32.mxu1 %vm948_vm2, %v949_v19 }
  0xfa   : > { %849 = vmatmul.mubr.msk.f32.gmra.mrb[2].mxu1 %vm477_vm3, %v443_v39 }
  0xfb   : > { %851 = vmatprep.mubr.msk.f32.mxu1 %vm948_vm2, %v949_v19 }
  0xfe   : > { %852 = vmatmul.mubr.msk.f32.gmra.mrb[4].mxu1 %vm477_vm3, %v444_v40 }
  0xff   : > { %854 = vmatprep.mubr.msk.f32.mxu1 %vm948_vm2, %v949_v19 }
 0x102   : > { %855 = vmatmul.mubr.msk.f32.gmra.mrb[6].mxu1 %vm477_vm3, %v445_v41 }
 0x103   : > { %857 = vmatprep.mubr.msk.f32.mxu1 %vm948_vm2, %v949_v19 }
 0x106   : > { %858 = vmatmul.mubr.msk.f32.gmra.mrb[8].mxu1 %vm477_vm3, %v446_v42 }
 0x1c9   : > { %v559_v43 = vpop.f32.mrb[0].mxu1 }
 0x1ca   : > { %v847_v44 = vpop.f32.mrb[1].mxu1  ;;  %v560_v46 = vadd.f32 %v559_v43, %v455_v45 }
 0x1cc   : > { %v583_v51 = vmax.f32 %v560_v46, 0.0 }
 0x1cd   : > { %v564_v48 = vpop.f32.mrb[2].mxu1 }
 0x1ce   : > { %v565_v49 = vadd.f32 %v564_v48, %v460_v47  ;;  %v850_v50 = vpop.f32.mrb[3].mxu1 }
 0x1d0   : > { %v584_v52 = vmax.f32 %v565_v49, 0.0 }
 0x1d1   : > { %v569_v53 = vpop.f32.mrb[4].mxu1 }
 0x1d2   : > { %v886_v54 = vpack.c.bf16 %v584_v52, %v583_v51  ;;  %v853_v55 = vpop.f32.mrb[5].mxu1  ;;  %v570_v57 = vadd.f32 %v569_v53, %v465_v56 }
 0x1d4   : > { %887 = vmatpush3.bf16.msra.mxu0 %v886_v54  ;;  %v585_v62 = vmax.f32 %v570_v57, 0.0 }
 0x1d5   : > { %v574_v59 = vpop.f32.mrb[6].mxu1  ;;  %888 = vmatprep.subr.bf16.mxu0 %v947_v18 }
 0x1d6   : > { %v575_v60 = vadd.f32 %v574_v59, %v470_v58  ;;  %v856_v61 = vpop.f32.mrb[7].mxu1 }
 0x1d8   : > { %v586_v63 = vmax.f32 %v575_v60, 0.0 }
 0x1d9   : > { %v579_v1 = vpop.f32.mrb[8].mxu1 }
 0x1da   : > { %v889_v2 = vpack.c.bf16 %v586_v63, %v585_v62  ;;  %v580_v3 = vadd.f32 %v579_v1, %v475_v0  ;;  %v859_v4 = vpop.f32.mrb[9].mxu1 }
 0x1dc   : > { %890 = vmatpush3.bf16.msra.mxu0 %v889_v2  ;;  %v587_v5 = vmax.f32 %v580_v3, 0.0 }
 0x1dd   : > { %868 = vmatprep.subr.mxu0 %v949_v19 }
 0x1e0   : > { %869 = vmatpush3.msra.mxu0 %v587_v5 }
 0x1e1   : > { %871 = vmatmul.mubr.msk.f32.vlgmr.msra.gmra.mrb[4].mxu0 %vm609_vm4, %v588_v6 }
 0x1e2   : > { %873 = vmatprep.mubr.msk.f32.mxu0 %vm948_vm2, %v949_v19 }
 0x1e5   : > { %874 = vmatmul.mubr.msk.f32.gmra.mrb[6].mxu0 %vm609_vm4, %v589_v7 }
 0x1e6   : > { %876 = vmatprep.mubr.msk.f32.mxu0 %vm948_vm2, %v949_v19  ;;  %v607_v19 = vpop.permute.xlu1 %606 }
 0x1e9   : > { %877 = vmatmul.mubr.msk.f32.gmra.mrb[8].mxu0 %vm609_vm4, %v590_v8 }
 0x2b4   : > { %v685_v10 = vpop.f32.mrb[4].mxu0 }
 0x2b5   : > { %v686_v11 = vadd.f32 %v685_v10, %v597_v9  ;;  %v872_v12 = vpop.f32.mrb[5].mxu0 }
 0x2b7   : > { %v699_v13 = vmax.f32 %v686_v11, 0.0 }
 0x2b8   : > { %v690_v15 = vpop.f32.mrb[6].mxu0 }
 0x2b9   : > { %702 = vst [vmem:[%s306_s22] sm:$0xff] %v699_v13  ;;  %v691_v16 = vadd.f32 %v690_v15, %v602_v14  ;;  %v875_v17 = vpop.f32.mrb[7].mxu0 }
 0x2bb   : > { %v700_v18 = vmax.f32 %v691_v16, 0.0 }
 0x2bc   : > { %v695_v20 = vpop.f32.mrb[8].mxu0 }
 0x2bd   : > { %703 = vst [vmem:[%s306_s22 + $0x8] sm:$0xff] %v700_v18  ;;  %v696_v21 = vadd.f32 %v695_v20, %v607_v19  ;;  %v878_v22 = vpop.f32.mrb[9].mxu0 }
 0x2bf   : > { %v701_v23 = vmax.f32 %v696_v21, 0.0 }
 0x2c1   : > { %704 = vst [vmem:[%s306_s22 + $0x10] sm:$0xf] %v701_v23 }
 0x2c2 PF: > { %s17_s26 = sadd.s32 1, %s944_s26   ;;  %s1128_s24 = smov %s940_s25 }
 0x2c3   : > { %p14_p5 = scmp.ge.s32.totalorder %s17_s26, 4   ;;  %s1129_s25 = smov %s1131_s27 }
 0x2c5   :  { %16 = sbr.rel (!%p14_p5) target bundleno = 2 (0x2), region = 78 }

</bundles_post_ra>
